<compile_context>
chip_gen: v5e
topology: v5e:2x2
jax: 0.10.0
libtpu: 0.0.40
codegen_flags: <defaults>
</compile_context>

<pallas_src>
import functools

import jax
import jax.numpy as jnp
from jax.experimental import pallas as pl
from jax.experimental.pallas import tpu as pltpu


def _round_up(x: int, m: int) -> int:
    return (x + m - 1) // m * m


def _ce_kernel(logits_ref, targets_ref, loss_ref, m_ref, l_ref, tgt_ref, *,
               num_classes: int, tile_c: int):
    """One (TN, TC) tile of logits; online logsumexp over the class axis."""
    j = pl.program_id(1)

    @pl.when(j == 0)
    def _init():
        m_ref[...] = jnp.full_like(m_ref, -jnp.inf)
        l_ref[...] = jnp.zeros_like(l_ref)
        tgt_ref[...] = jnp.zeros_like(tgt_ref)

    x = logits_ref[...]                      # (TN, TC), input dtype (f32 / bf16)
    t = targets_ref[...]                     # (TN, 1) int32

    # Target-logit pick inside this class tile via one-hot masked sum
    # (no dynamic gather on TPU).  Compare/select stay in the input dtype
    # (bf16-friendly on v6e); -inf padding columns can never equal a valid
    # target index, so they are never selected.
    col = jax.lax.broadcasted_iota(jnp.int32, x.shape, 1) + j * tile_c
    picked = jnp.where(col == t, x, jnp.zeros_like(x)).astype(jnp.float32)
    tgt_ref[...] += jnp.sum(picked, axis=-1, keepdims=True)

    # Online logsumexp update (exp/log kept in f32 on the EUP).
    xf = x.astype(jnp.float32)
    m_old = m_ref[...]
    m_new = jnp.maximum(m_old, jnp.max(x, axis=-1, keepdims=True).astype(jnp.float32))
    l_ref[...] = (l_ref[...] * jnp.exp(m_old - m_new)
                  + jnp.sum(jnp.exp(xf - m_new), axis=-1, keepdims=True))
    m_ref[...] = m_new

    @pl.when(j == pl.num_programs(1) - 1)
    def _finalize():
        lse = m_ref[...] + jnp.log(l_ref[...])
        # Rows with target outside [0, num_classes) contribute 0: this covers
        # both the batch padding rows (target = -1) and PyTorch's default
        # ignore_index = -100.
        valid = (t >= 0) & (t < num_classes)
        loss_ref[...] = jnp.where(valid, lse - tgt_ref[...], 0.0)


def classification_loss(logits, targets):
    """nn.CrossEntropyLoss()(logits, targets): logits (N, C), targets (N,) ints."""
    n, c = logits.shape
    targets = targets.astype(jnp.int32)

    # ---------------- tiling / padding ----------------
    tile_c = min(_round_up(c, 128), 2048)                 # lane-dense class tile
    c_pad = _round_up(_round_up(c, 128), tile_c)
    tile_n = min(_round_up(n, 8), 256)                    # sublane-aligned batch tile
    n_pad = _round_up(n, tile_n)

    x = logits
    if c_pad > c:       # pad class axis with -inf: max / lse unchanged
        x = jnp.pad(x, ((0, 0), (0, c_pad - c)), constant_values=float("-inf"))
    if n_pad > n:       # pad batch axis with zero rows (masked in kernel)
        x = jnp.pad(x, ((0, n_pad - n), (0, 0)), constant_values=0.0)

    t2d = targets.reshape(n, 1)
    if n_pad > n:
        t2d = jnp.pad(t2d, ((0, n_pad - n), (0, 0)), constant_values=-1)

    grid = (n_pad // tile_n, c_pad // tile_c)
    kernel = functools.partial(_ce_kernel, num_classes=c, tile_c=tile_c)

    itemsize = jnp.dtype(logits.dtype).itemsize
    cost = pl.CostEstimate(
        flops=5 * n_pad * c_pad,
        transcendentals=n_pad * c_pad,
        bytes_accessed=n_pad * c_pad * itemsize + n_pad * 4 + n_pad * 4,
    )

    per_row_loss = pl.pallas_call(
        kernel,
        out_shape=jax.ShapeDtypeStruct((n_pad, 1), jnp.float32),
        grid_spec=pltpu.PrefetchScalarGridSpec(
            num_scalar_prefetch=0,
            grid=grid,
            in_specs=[
                pl.BlockSpec((tile_n, tile_c), lambda i, j: (i, j)),   # logits
                pl.BlockSpec((tile_n, 1), lambda i, j: (i, 0)),        # targets
            ],
            out_specs=pl.BlockSpec((tile_n, 1), lambda i, j: (i, 0)),  # per-row loss
            scratch_shapes=[
                pltpu.VMEM((tile_n, 1), jnp.float32),   # running max m
                pltpu.VMEM((tile_n, 1), jnp.float32),   # running sum of exp l
                pltpu.VMEM((tile_n, 1), jnp.float32),   # running target logit
            ],
        ),
        compiler_params=pltpu.CompilerParams(
            dimension_semantics=("parallel", "arbitrary"),
        ),
        cost_estimate=cost,
    )(x, t2d)

    # Mean over non-ignored targets (PyTorch default ignore_index=-100 is < 0).
    valid = (targets >= 0) & (targets < c)
    num_valid = jnp.sum(valid.astype(jnp.float32))
    return jnp.sum(per_row_loss) / num_valid


if __name__ == "__main__":
    key = jax.random.PRNGKey(0)
    k1, k2, k3, k4 = jax.random.split(key, 4)

    # --- case 1: small aligned-ish shape (batch=8, classes=32) ---
    N, C = 8, 32
    logits = jax.random.normal(k1, (N, C), dtype=jnp.float32)
    targets = jax.random.randint(k2, (N,), 0, C, dtype=jnp.int32)

    loss = classification_loss(logits, targets)
    jax.block_until_ready(loss)

    logp = jax.nn.log_softmax(logits, axis=-1)
    ref = -jnp.mean(jnp.take_along_axis(logp, targets[:, None], axis=-1))
    assert jnp.allclose(loss, ref, atol=1e-5, rtol=1e-5), (loss, ref)

    # --- case 2: ragged shape + ignore_index=-100 (exercises padding/masking) ---
    N2, C2 = 10, 200
    logits2 = jax.random.normal(k3, (N2, C2), dtype=jnp.float32)
    targets2 = jax.random.randint(k4, (N2,), 0, C2, dtype=jnp.int32)
    targets2 = targets2.at[3].set(-100)   # ignored row, PyTorch default ignore_index

    loss2 = classification_loss(logits2, targets2)
    jax.block_until_ready(loss2)

    logp2 = jax.nn.log_softmax(logits2, axis=-1)
    valid2 = targets2 >= 0
    safe_t = jnp.where(valid2, targets2, 0)
    picked2 = jnp.take_along_axis(logp2, safe_t[:, None], axis=-1)[:, 0]
    ref2 = -jnp.sum(jnp.where(valid2, picked2, 0.0)) / jnp.sum(valid2).astype(jnp.float32)
    assert jnp.allclose(loss2, ref2, atol=1e-5, rtol=1e-5), (loss2, ref2)

    print("KERNEL_OK")
</pallas_src>

<mosaic_0001>
module attributes {stable_mosaic.version = 11 : i64} {
  func.func @_ce_kernel(%arg0: i32, %arg1: i32, %arg2: memref<8x128xf32, #tpu.memory_space<vmem>>, %arg3: memref<8x1xi32, #tpu.memory_space<vmem>>, %arg4: memref<8x1xf32, #tpu.memory_space<vmem>>, %arg5: memref<8x1xf32, #tpu.memory_space<vmem>>, %arg6: memref<8x1xf32, #tpu.memory_space<vmem>>, %arg7: memref<8x1xf32, #tpu.memory_space<vmem>>) attributes {dimension_semantics = [#tpu.dimension_semantics<parallel>, #tpu.dimension_semantics<arbitrary>], iteration_bounds = array<i64: 1, 1>, scalar_prefetch = 0 : i64, scratch_operands = 3 : i64, tpu.core_type = #tpu.core_type<tc>, window_params = [{transform_indices = @transform_0, window_bounds = array<i64: 8, 128>}, {transform_indices = @transform_1, window_bounds = array<i64: 8, 1>}, {transform_indices = @transform_2, window_bounds = array<i64: 8, 1>}]} {
    %c0_i32 = arith.constant 0 : i32
    %0 = arith.cmpi eq, %arg1, %c0_i32 : i32
    %1 = arith.extui %0 : i1 to i32
    %c0_i32_0 = arith.constant 0 : i32
    %2 = arith.cmpi ne, %1, %c0_i32_0 : i32
    scf.if %2 {
      %cst_21 = arith.constant 0xFF800000 : f32
      %37 = vector.broadcast %cst_21 : f32 to vector<8x1xf32>
      %c0_22 = arith.constant 0 : index
      %c0_23 = arith.constant 0 : index
      %38 = vector.load %arg5[%c0_22, %c0_23] : memref<8x1xf32, #tpu.memory_space<vmem>>, vector<8x1xf32>
      tpu.vector_store %arg5[%c0_22, %c0_23], %37 {strides = array<i32>} : memref<8x1xf32, #tpu.memory_space<vmem>>, vector<8x1xf32>,
      %cst_24 = arith.constant 0.000000e+00 : f32
      %39 = vector.broadcast %cst_24 : f32 to vector<8x1xf32>
      %c0_25 = arith.constant 0 : index
      %c0_26 = arith.constant 0 : index
      %40 = vector.load %arg6[%c0_25, %c0_26] : memref<8x1xf32, #tpu.memory_space<vmem>>, vector<8x1xf32>
      tpu.vector_store %arg6[%c0_25, %c0_26], %39 {strides = array<i32>} : memref<8x1xf32, #tpu.memory_space<vmem>>, vector<8x1xf32>,
      %cst_27 = arith.constant 0.000000e+00 : f32
      %41 = vector.broadcast %cst_27 : f32 to vector<8x1xf32>
      %c0_28 = arith.constant 0 : index
      %c0_29 = arith.constant 0 : index
      %42 = vector.load %arg7[%c0_28, %c0_29] : memref<8x1xf32, #tpu.memory_space<vmem>>, vector<8x1xf32>
      tpu.vector_store %arg7[%c0_28, %c0_29], %41 {strides = array<i32>} : memref<8x1xf32, #tpu.memory_space<vmem>>, vector<8x1xf32>,
    } else {
    }
    %c0 = arith.constant 0 : index
    %c0_1 = arith.constant 0 : index
    %3 = vector.load %arg2[%c0, %c0_1] : memref<8x128xf32, #tpu.memory_space<vmem>>, vector<8x128xf32>
    %c0_2 = arith.constant 0 : index
    %c0_3 = arith.constant 0 : index
    %4 = vector.load %arg3[%c0_2, %c0_3] : memref<8x1xi32, #tpu.memory_space<vmem>>, vector<8x1xi32>
    %5 = tpu.iota {dimensions = array<i32: 1>} : vector<8x128xi32>
    %c128_i32 = arith.constant 128 : i32
    %6 = arith.muli %arg1, %c128_i32 : i32
    %7 = vector.broadcast %6 : i32 to vector<8x128xi32>
    %8 = arith.addi %5, %7 : vector<8x128xi32>
    %9 = vector.broadcast %4 : vector<8x1xi32> to vector<8x128xi32>
    %10 = arith.cmpi eq, %8, %9 : vector<8x128xi32>
    %cst = arith.constant 0.000000e+00 : f32
    %11 = vector.broadcast %cst : f32 to vector<8x128xf32>
    %12 = arith.select %10, %3, %11 : vector<8x128xi1>, vector<8x128xf32>
    %c0_4 = arith.constant 0 : index
    %c0_5 = arith.constant 0 : index
    %13 = vector.load %arg7[%c0_4, %c0_5] : memref<8x1xf32, #tpu.memory_space<vmem>>, vector<8x1xf32>
    %cst_6 = arith.constant dense<0.000000e+00> : vector<8xf32>
    %14 = vector.multi_reduction <add>, %12, %cst_6 [1] : vector<8x128xf32> to vector<8xf32>
    %15 = vector.shape_cast %14 : vector<8xf32> to vector<8x1xf32>
    %16 = arith.addf %13, %15 : vector<8x1xf32>
    %c0_7 = arith.constant 0 : index
    %c0_8 = arith.constant 0 : index
    %17 = vector.load %arg7[%c0_7, %c0_8] : memref<8x1xf32, #tpu.memory_space<vmem>>, vector<8x1xf32>
    tpu.vector_store %arg7[%c0_7, %c0_8], %16 {strides = array<i32>} : memref<8x1xf32, #tpu.memory_space<vmem>>, vector<8x1xf32>,
    %c0_9 = arith.constant 0 : index
    %c0_10 = arith.constant 0 : index
    %18 = vector.load %arg5[%c0_9, %c0_10] : memref<8x1xf32, #tpu.memory_space<vmem>>, vector<8x1xf32>
    %cst_11 = arith.constant dense<0xFF800000> : vector<8xf32>
    %19 = vector.multi_reduction <maximumf>, %3, %cst_11 [1] : vector<8x128xf32> to vector<8xf32>
    %20 = vector.shape_cast %19 : vector<8xf32> to vector<8x1xf32>
    %21 = arith.maximumf %18, %20 : vector<8x1xf32>
    %c0_12 = arith.constant 0 : index
    %c0_13 = arith.constant 0 : index
    %22 = vector.load %arg6[%c0_12, %c0_13] : memref<8x1xf32, #tpu.memory_space<vmem>>, vector<8x1xf32>
    %23 = arith.subf %18, %21 : vector<8x1xf32>
    %24 = math.exp %23 : vector<8x1xf32>
    %25 = arith.mulf %22, %24 : vector<8x1xf32>
    %26 = vector.broadcast %21 : vector<8x1xf32> to vector<8x128xf32>
    %27 = arith.subf %3, %26 : vector<8x128xf32>
    %28 = math.exp %27 : vector<8x128xf32>
    %cst_14 = arith.constant dense<0.000000e+00> : vector<8xf32>
    %29 = vector.multi_reduction <add>, %28, %cst_14 [1] : vector<8x128xf32> to vector<8xf32>
    %30 = vector.shape_cast %29 : vector<8xf32> to vector<8x1xf32>
    %31 = arith.addf %25, %30 : vector<8x1xf32>
    %c0_15 = arith.constant 0 : index
    %c0_16 = arith.constant 0 : index
    %32 = vector.load %arg6[%c0_15, %c0_16] : memref<8x1xf32, #tpu.memory_space<vmem>>, vector<8x1xf32>
    tpu.vector_store %arg6[%c0_15, %c0_16], %31 {strides = array<i32>} : memref<8x1xf32, #tpu.memory_space<vmem>>, vector<8x1xf32>,
    %c0_17 = arith.constant 0 : index
    %c0_18 = arith.constant 0 : index
    %33 = vector.load %arg5[%c0_17, %c0_18] : memref<8x1xf32, #tpu.memory_space<vmem>>, vector<8x1xf32>
    tpu.vector_store %arg5[%c0_17, %c0_18], %21 {strides = array<i32>} : memref<8x1xf32, #tpu.memory_space<vmem>>, vector<8x1xf32>,
    %c0_i32_19 = arith.constant 0 : i32
    %34 = arith.cmpi eq, %arg1, %c0_i32_19 : i32
    %35 = arith.extui %34 : i1 to i32
    %c0_i32_20 = arith.constant 0 : i32
    %36 = arith.cmpi ne, %35, %c0_i32_20 : i32
    scf.if %36 {
      %c0_21 = arith.constant 0 : index
      %c0_22 = arith.constant 0 : index
      %37 = vector.load %arg5[%c0_21, %c0_22] : memref<8x1xf32, #tpu.memory_space<vmem>>, vector<8x1xf32>
      %c0_23 = arith.constant 0 : index
      %c0_24 = arith.constant 0 : index
      %38 = vector.load %arg6[%c0_23, %c0_24] : memref<8x1xf32, #tpu.memory_space<vmem>>, vector<8x1xf32>
      %39 = math.log %38 : vector<8x1xf32>
      %40 = arith.addf %37, %39 : vector<8x1xf32>
      %c0_i32_25 = arith.constant 0 : i32
      %41 = vector.broadcast %c0_i32_25 : i32 to vector<8x1xi32>
      %42 = arith.cmpi sge, %4, %41 : vector<8x1xi32>
      %c32_i32 = arith.constant 32 : i32
      %43 = vector.broadcast %c32_i32 : i32 to vector<8x1xi32>
      %44 = arith.cmpi slt, %4, %43 : vector<8x1xi32>
      %45 = arith.andi %42, %44 : vector<8x1xi1>
      %c0_26 = arith.constant 0 : index
      %c0_27 = arith.constant 0 : index
      %46 = vector.load %arg7[%c0_26, %c0_27] : memref<8x1xf32, #tpu.memory_space<vmem>>, vector<8x1xf32>
      %47 = arith.subf %40, %46 : vector<8x1xf32>
      %cst_28 = arith.constant 0.000000e+00 : f32
      %48 = vector.broadcast %cst_28 : f32 to vector<8x1xf32>
      %49 = arith.select %45, %47, %48 : vector<8x1xi1>, vector<8x1xf32>
      %c0_29 = arith.constant 0 : index
      %c0_30 = arith.constant 0 : index
      %50 = vector.load %arg4[%c0_29, %c0_30] : memref<8x1xf32, #tpu.memory_space<vmem>>, vector<8x1xf32>
      tpu.vector_store %arg4[%c0_29, %c0_30], %49 {strides = array<i32>} : memref<8x1xf32, #tpu.memory_space<vmem>>, vector<8x1xf32>,
    } else {
    }
    return
  }
  func.func @transform_0(%arg0: i32, %arg1: i32) -> (i32, i32) {
    %c0_i32 = arith.constant 0 : i32
    return %arg0, %arg1 : i32, i32
  }
  func.func @transform_1(%arg0: i32, %arg1: i32) -> (i32, i32) {
    %c0_i32 = arith.constant 0 : i32
    %c0_i32_0 = arith.constant 0 : i32
    return %arg0, %c0_i32 : i32, i32
  }
  func.func @transform_2(%arg0: i32, %arg1: i32) -> (i32, i32) {
    %c0_i32 = arith.constant 0 : i32
    %c0_i32_0 = arith.constant 0 : i32
    return %arg0, %c0_i32 : i32, i32
  }
}

</mosaic_0001>

<bundles_post_ra>
// kernel: tpu_custom_call.1
= control target key start
LH: loop header
LB: loop body
LE: loop exit
PB: predicated region body
PF: predicated region fallthrough
CT: control target
= control target key end

     0   :  { %vm15_vm0 = vcmask 7168   ;;  %v89_v1 = vmov -inf   ;;  %v90_v2 = vmov 0   ;;  %v91_v3 = vmov 0.0   ;;  %s123_s0 = inlined_call_operand.vmem [shape: f32[8,128], index: 0, kind: input, shape index: {}]   ;;  %s124_s1 = inlined_call_operand.vmem [shape: s32[8,1], index: 1, kind: input, shape index: {}]   ;;  %s125_s2 = inlined_call_operand.vmem [shape: f32[8,1], index: 2, kind: output, shape index: {}]  }
   0x1   :  { %v19_v0 = vld [vmem:[%s123_s0] sm:$0xff]  ;;  %16 = vst.msk [vmem:[#allocation2] sm:$0xff] %vm15_vm0, %v89_v1  ;;  %81 = vset.pattern.permute.xlu0 %v90_v2  ;;  %82 = vset.pattern.permute.xlu1 %v90_v2  ;;  %v21_v9 = vlaneseq }
   0x2   :  { %38 = vmax.xlane.f32.xlu0 %v19_v0  ;;  %17 = vst.msk [vmem:[#allocation3] sm:$0xff] %vm15_vm0, %v91_v3  ;;  %v20_v4 = vld [vmem:[%s124_s1] sm:$0xff] }
   0x3   :  { %18 = vst.msk [vmem:[#allocation4] sm:$0xff] %vm15_vm0, %v91_v3  ;;  %27 = vperm.xlu1 %82, %v20_v4   ;;  %v22_v11 = vand.u32 127, %v21_v9  ;;  %vm67_vm2 = vcmp.ge.s32.totalorder %v20_v4, 0  ;;  %vm68_vm3 = vcmp.lt.s32.totalorder %v20_v4, 32 }
   0x4   :  { %vm69_vm4 = vmand %vm67_vm2, %vm68_vm3 }
   0x8   :  { %v37_v5 = vld [vmem:[#allocation2] sm:$0xff] }
   0x9   :  { %v41_v22 = vld [vmem:[#allocation3] sm:$0xff] }
   0xa   :  { %v31_v17 = vld [vmem:[#allocation4] sm:$0xff] }
  0x75   :  { %v39_v6 = vpop.xlane.xlu0 %38  ;;  %v28_v10 = vpop.permute.xlu1 %27 }
  0x76   :  { %v40_v7 = vmax.f32 %v37_v5, %v39_v6  ;;  %vm29_vm1 = vcmp.eq.s32.totalorder %v22_v11, %v28_v10 }
  0x77   :  { %v30_v12 = vsel %vm29_vm1, %v19_v0, 0.0 }
  0x78   :  { %v42_v8 = vsub.f32 %v37_v5, %v40_v7  ;;  %58 = vst.msk [vmem:[#allocation2] sm:$0xff] %vm15_vm0, %v40_v7  ;;  %48 = vperm.xlu0 %81, %v40_v7   ;;  %32 = vadd.xlane.f32.xlu2 %v30_v12 }
  0x7a   :  { %v43_v20 = vmul.f32 1.442695, %v42_v8 }
  0x7f   :  { %v62_v29 = vld [vmem:[#allocation2] sm:$0xff] }
  0xea   :  { %v49_v13 = vpop.permute.xlu0 %48 }
  0xeb   :  { %v51_v14 = vsub.f32 %v19_v0, %v49_v13  ;;  %v33_v18 = vpop.xlane.xlu2 %32 }
  0xec   :  { %v34_v19 = vadd.f32 %v33_v18, %v31_v17 }
  0xed   :  { %v52_v15 = vmul.f32 1.442695, %v51_v14 }
  0xee   :  { %36 = vst.msk [vmem:[#allocation4] sm:$0xff] %vm15_vm0, %v34_v19 }
  0xef   :  { %83 = vpow2.f32 %v52_v15 }
  0xf0   :  { %85 = vpow2.f32 %v43_v20 }
  0xf5   :  { %v84_v16 = vpop.eup %83  ;;  %v70_v30 = vld [vmem:[#allocation4] sm:$0xff] }
  0xf6   :  { %54 = vadd.xlane.f32.xlu1 %v84_v16  ;;  %v86_v21 = vpop.eup %85 }
  0xf7   :  { %v45_v23 = vmul.f32 %v86_v21, %v41_v22 }
 0x169   :  { %v55_v24 = vpop.xlane.xlu1 %54 }
 0x16a   :  { %v56_v25 = vadd.f32 %v55_v24, %v45_v23 }
 0x16c   :  { %57 = vst.msk [vmem:[#allocation3] sm:$0xff] %vm15_vm0, %v56_v25 }
 0x173   :  { %v63_v26 = vld [vmem:[#allocation3] sm:$0xff] }
 0x174   :  { %87 = vlog2.f32 %v63_v26 }
 0x17a   :  { %v88_v27 = vpop.eup %87 }
 0x17b   :  { %v65_v28 = vmul.f32 0.6931472, %v88_v27 }
 0x17d   :  { %v66_v31 = vadd.f32 %v65_v28, %v62_v29 }
 0x17f   :  { %v71_v32 = vsub.f32 %v66_v31, %v70_v30 }
 0x181   :  { %v72_v33 = vsel %vm69_vm4, %v71_v32, 0.0 }
 0x182   :  { %73 = vst.msk [vmem:[%s125_s2] sm:$0xff] %vm15_vm0, %v72_v33 }

</bundles_post_ra>
